<compile_context>
chip_gen: v7x
topology: tpu7x:2x2x1
jax: 0.10.0
libtpu: 0.0.40
codegen_flags: <defaults>
</compile_context>

<pallas_src>
import jax
import jax.numpy as jnp
import numpy as np
from jax.experimental import pallas as pl
from jax.experimental.pallas import tpu as pltpu

# Per-channel positive-class weights from the original module.
WTS = np.array(
    [36.64341412, 30.19407855, 106.23704066, 25.58503269, 100.4556983, 167.64383946],
    dtype=np.float32,
)

_INV255 = np.float32(1.0 / 255.0)


def _bce_partial_kernel(pwm1_ref, pred_ref, tgt_ref, out_ref, acc_ref):
    """One (spatial_chunk j, batch i) grid step.

    pwm1_ref : (C, 1)     pos_weight - 1 (tiny, constant across the grid)
    pred_ref : (1, C, T)  logits tile, NCHW layout (C on sublanes, T on lanes)
    tgt_ref  : (1, T, C)  raw target tile, NHWC layout (permute fused in-kernel)
    out_ref  : (1, 1)     per-chunk partial sum, written on the last batch step
    acc_ref  : (C, T)     elementwise f32 accumulator scratch
    """
    i = pl.program_id(1)  # batch index == reduction ("arbitrary") axis, innermost

    @pl.when(i == 0)
    def _init():
        acc_ref[...] = jnp.zeros_like(acc_ref)

    x = pred_ref[0]                              # (C, T) logits
    # Fused NHWC->NCHW permute: transpose the small (T, C) tile on the XLU
    # instead of paying a separate XLA transpose pass over HBM.
    z = jnp.transpose(tgt_ref[0]) * _INV255      # (C, T), target scaled to [0, 1]
    pwm1 = pwm1_ref[...]                         # (C, 1), broadcasts over lanes

    # Numerically stable BCE-with-logits + pos_weight (matches PyTorch):
    #   f    = log1p(exp(-|x|)) + max(-x, 0)          (= softplus(-x))
    #   loss = (1 - z) * x + (1 + (pw - 1) * z) * f
    f = jnp.log1p(jnp.exp(-jnp.abs(x))) + jnp.maximum(-x, 0.0)
    loss = (1.0 - z) * x + (1.0 + pwm1 * z) * f

    acc_ref[...] = acc_ref[...] + loss           # elementwise accumulate (VPU)

    @pl.when(i == pl.num_programs(1) - 1)
    def _flush():
        out_ref[...] = jnp.broadcast_to(jnp.sum(acc_ref[...]), (1, 1))


def _pick_spatial_tile(hw, cap=8192):
    """Largest multiple-of-128 divisor of hw (capped); else the whole row."""
    if hw <= cap:
        return hw
    t = (cap // 128) * 128
    while t >= 128:
        if hw % t == 0:
            return t
        t -= 128
    # TODO(synk): pad hw to a multiple of 128 for awkward spatial sizes; the
    # whole-row fallback below is correct but uses a single large block.
    return hw


def my_loss_pallas(pred, target, *, reduction="mean", loss_weight=1.0):
    """JAX/Pallas equivalent of MyLoss.forward (weight=None, avg_factor=None)."""
    N, C, H, W = pred.shape
    assert C == WTS.shape[0], "channel count must match the 6 pos_weights"
    assert target.shape == (N, H, W, C), "target must be NHWC matching pred NCHW"

    hw = H * W
    tile = _pick_spatial_tile(hw)
    num_chunks = hw // tile

    # NCHW logits flatten to (N, C, H*W); NHWC targets flatten for free to
    # (N, H*W, C) -- the permute itself is fused into the kernel.
    pred2 = pred.reshape(N, C, hw).astype(jnp.float32)
    tgt2 = target.reshape(N, hw, C).astype(jnp.float32)
    pwm1 = jnp.asarray(WTS - np.float32(1.0)).reshape(C, 1)

    partials = pl.pallas_call(
        _bce_partial_kernel,
        out_shape=jax.ShapeDtypeStruct((num_chunks, 1), jnp.float32),
        grid_spec=pltpu.PrefetchScalarGridSpec(
            num_scalar_prefetch=0,
            grid=(num_chunks, N),                                   # (parallel, reduction)
            in_specs=[
                pl.BlockSpec((C, 1), lambda j, i: (0, 0)),           # pos_weight - 1
                pl.BlockSpec((1, C, tile), lambda j, i: (i, 0, j)),  # pred  (NCHW)
                pl.BlockSpec((1, tile, C), lambda j, i: (i, j, 0)),  # target (NHWC)
            ],
            out_specs=pl.BlockSpec((1, 1), lambda j, i: (j, 0)),
            scratch_shapes=[pltpu.VMEM((C, tile), jnp.float32)],
        ),
        compiler_params=pltpu.CompilerParams(
            dimension_semantics=("parallel", "arbitrary"),
            vmem_limit_bytes=32 * 1024 * 1024,
        ),
    )(pwm1, pred2, tgt2)

    s = jnp.sum(partials)
    if reduction == "mean":
        loss = s / jnp.float32(N * C * H * W)
    elif reduction == "sum":
        loss = s
    else:
        # TODO(synk): reduction='none' (elementwise map output) not implemented here.
        raise NotImplementedError("reduction='none' not supported in this kernel")
    return jnp.float32(loss_weight) * loss


def _reference(pred, target, *, reduction="mean", loss_weight=1.0):
    """Pure-jnp reference for validation."""
    target_nchw = jnp.transpose(target, (0, 3, 1, 2)).astype(jnp.float32)
    x = pred.astype(jnp.float32)
    z = target_nchw / 255.0
    pw = jnp.asarray(WTS).reshape(1, -1, 1, 1)
    log_weight = 1.0 + (pw - 1.0) * z
    loss = (1.0 - z) * x + log_weight * (
        jnp.log1p(jnp.exp(-jnp.abs(x))) + jnp.maximum(-x, 0.0)
    )
    if reduction == "mean":
        loss = jnp.mean(loss)
    elif reduction == "sum":
        loss = jnp.sum(loss)
    return loss_weight * loss


if __name__ == "__main__":
    key = jax.random.PRNGKey(0)
    k1, k2 = jax.random.split(key)

    N, C, H, W = 2, 6, 16, 16
    pred = jax.random.normal(k1, (N, C, H, W), dtype=jnp.float32)              # logits, NCHW
    target = jax.random.uniform(k2, (N, H, W, C), dtype=jnp.float32) * 255.0   # NHWC, [0, 255]

    out = my_loss_pallas(pred, target, reduction="mean", loss_weight=1.0)
    out = jax.block_until_ready(out)

    ref = jax.block_until_ready(_reference(pred, target, reduction="mean", loss_weight=1.0))
    np.testing.assert_allclose(np.asarray(out), np.asarray(ref), rtol=1e-5, atol=1e-5)

    print("KERNEL_OK")
</pallas_src>

<mosaic_0001>
module attributes {stable_mosaic.version = 11 : i64} {
  func.func @_bce_partial_kernel(%arg0: i32, %arg1: i32, %arg2: memref<6x1xf32, #tpu.memory_space<vmem>>, %arg3: memref<1x6x256xf32, #tpu.memory_space<vmem>>, %arg4: memref<1x256x6xf32, #tpu.memory_space<vmem>>, %arg5: memref<1x1xf32, #tpu.memory_space<vmem>>, %arg6: memref<6x256xf32, #tpu.memory_space<vmem>>) attributes {dimension_semantics = [#tpu.dimension_semantics<parallel>, #tpu.dimension_semantics<arbitrary>], iteration_bounds = array<i64: 1, 2>, scalar_prefetch = 0 : i64, scratch_operands = 1 : i64, tpu.core_type = #tpu.core_type<tc>, window_params = [{pipeline_mode = #tpu.pipeline_mode<synchronous>, transform_indices = @transform_0, window_bounds = array<i64: 6, 1>}, {transform_indices = @transform_1, window_bounds = array<i64: 1, 6, 256>}, {transform_indices = @transform_2, window_bounds = array<i64: 1, 256, 6>}, {transform_indices = @transform_3, window_bounds = array<i64: 1, 1>}]} {
    %c0_i32 = arith.constant 0 : i32
    %0 = arith.cmpi eq, %arg1, %c0_i32 : i32
    %1 = arith.extui %0 : i1 to i32
    %c0_i32_0 = arith.constant 0 : i32
    %2 = arith.cmpi ne, %1, %c0_i32_0 : i32
    scf.if %2 {
      %cst_18 = arith.constant 0.000000e+00 : f32
      %36 = vector.broadcast %cst_18 : f32 to vector<6x256xf32>
      %c0_19 = arith.constant 0 : index
      %c0_20 = arith.constant 0 : index
      %37 = vector.load %arg6[%c0_19, %c0_20] : memref<6x256xf32, #tpu.memory_space<vmem>>, vector<6x256xf32>
      tpu.vector_store %arg6[%c0_19, %c0_20], %36 {strides = array<i32>} : memref<6x256xf32, #tpu.memory_space<vmem>>, vector<6x256xf32>,
    } else {
    }
    %c0 = arith.constant 0 : index
    %c0_1 = arith.constant 0 : index
    %c0_2 = arith.constant 0 : index
    %3 = vector.load %arg3[%c0, %c0_1, %c0_2] : memref<1x6x256xf32, #tpu.memory_space<vmem>>, vector<1x6x256xf32>
    %4 = vector.shape_cast %3 : vector<1x6x256xf32> to vector<6x256xf32>
    %c0_3 = arith.constant 0 : index
    %c0_4 = arith.constant 0 : index
    %c0_5 = arith.constant 0 : index
    %5 = vector.load %arg4[%c0_3, %c0_4, %c0_5] : memref<1x256x6xf32, #tpu.memory_space<vmem>>, vector<1x256x6xf32>
    %6 = vector.shape_cast %5 : vector<1x256x6xf32> to vector<256x6xf32>
    %7 = tpu.transpose %6, [1, 0] : vector<256x6xf32> -> vector<6x256xf32>
    %cst = arith.constant 0.00392156886 : f32
    %8 = vector.broadcast %cst : f32 to vector<6x256xf32>
    %9 = arith.mulf %7, %8 : vector<6x256xf32>
    %c0_6 = arith.constant 0 : index
    %c0_7 = arith.constant 0 : index
    %10 = vector.load %arg2[%c0_6, %c0_7] : memref<6x1xf32, #tpu.memory_space<vmem>>, vector<6x1xf32>
    %11 = math.absf %4 : vector<6x256xf32>
    %cst_8 = arith.constant 0.000000e+00 : f32
    %12 = vector.broadcast %cst_8 : f32 to vector<6x256xf32>
    %13 = arith.subf %12, %11 : vector<6x256xf32>
    %14 = math.exp %13 : vector<6x256xf32>
    %15 = math.log1p %14 : vector<6x256xf32>
    %cst_9 = arith.constant 0.000000e+00 : f32
    %16 = vector.broadcast %cst_9 : f32 to vector<6x256xf32>
    %17 = arith.subf %16, %4 : vector<6x256xf32>
    %cst_10 = arith.constant 0.000000e+00 : f32
    %18 = vector.broadcast %cst_10 : f32 to vector<6x256xf32>
    %19 = arith.maximumf %17, %18 : vector<6x256xf32>
    %20 = arith.addf %15, %19 : vector<6x256xf32>
    %cst_11 = arith.constant 1.000000e+00 : f32
    %21 = vector.broadcast %cst_11 : f32 to vector<6x256xf32>
    %22 = arith.subf %21, %9 : vector<6x256xf32>
    %23 = arith.mulf %22, %4 : vector<6x256xf32>
    %24 = vector.broadcast %10 : vector<6x1xf32> to vector<6x256xf32>
    %25 = arith.mulf %24, %9 : vector<6x256xf32>
    %cst_12 = arith.constant 1.000000e+00 : f32
    %26 = vector.broadcast %cst_12 : f32 to vector<6x256xf32>
    %27 = arith.addf %26, %25 : vector<6x256xf32>
    %28 = arith.mulf %27, %20 : vector<6x256xf32>
    %29 = arith.addf %23, %28 : vector<6x256xf32>
    %c0_13 = arith.constant 0 : index
    %c0_14 = arith.constant 0 : index
    %30 = vector.load %arg6[%c0_13, %c0_14] : memref<6x256xf32, #tpu.memory_space<vmem>>, vector<6x256xf32>
    %31 = arith.addf %30, %29 : vector<6x256xf32>
    %c0_15 = arith.constant 0 : index
    %c0_16 = arith.constant 0 : index
    %32 = vector.load %arg6[%c0_15, %c0_16] : memref<6x256xf32, #tpu.memory_space<vmem>>, vector<6x256xf32>
    tpu.vector_store %arg6[%c0_15, %c0_16], %31 {strides = array<i32>} : memref<6x256xf32, #tpu.memory_space<vmem>>, vector<6x256xf32>,
    %c1_i32 = arith.constant 1 : i32
    %33 = arith.cmpi eq, %arg1, %c1_i32 : i32
    %34 = arith.extui %33 : i1 to i32
    %c0_i32_17 = arith.constant 0 : i32
    %35 = arith.cmpi ne, %34, %c0_i32_17 : i32
    scf.if %35 {
      %c0_18 = arith.constant 0 : index
      %c0_19 = arith.constant 0 : index
      %36 = vector.load %arg6[%c0_18, %c0_19] : memref<6x256xf32, #tpu.memory_space<vmem>>, vector<6x256xf32>
      %37 = vector.shape_cast %36 : vector<6x256xf32> to vector<1x6x256xf32>
      %cst_20 = arith.constant dense<0.000000e+00> : vector<1xf32>
      %38 = vector.multi_reduction <add>, %37, %cst_20 [1, 2] : vector<1x6x256xf32> to vector<1xf32>
      %39 = vector.shape_cast %38 : vector<1xf32> to vector<1x1x1xf32>
      %40 = vector.extract %39[0, 0, 0] : f32 from vector<1x1x1xf32>
      %41 = vector.broadcast %40 : f32 to vector<1x1xf32>
      %c0_21 = arith.constant 0 : index
      %c0_22 = arith.constant 0 : index
      %42 = vector.load %arg5[%c0_21, %c0_22] : memref<1x1xf32, #tpu.memory_space<vmem>>, vector<1x1xf32>
      tpu.vector_store %arg5[%c0_21, %c0_22], %41 {strides = array<i32>} : memref<1x1xf32, #tpu.memory_space<vmem>>, vector<1x1xf32>,
    } else {
    }
    return
  }
  func.func @transform_0(%arg0: i32, %arg1: i32) -> (i32, i32) {
    %c0_i32 = arith.constant 0 : i32
    %c0_i32_0 = arith.constant 0 : i32
    %c0_i32_1 = arith.constant 0 : i32
    return %c0_i32, %c0_i32_0 : i32, i32
  }
  func.func @transform_1(%arg0: i32, %arg1: i32) -> (i32, i32, i32) {
    %c0_i32 = arith.constant 0 : i32
    %c0_i32_0 = arith.constant 0 : i32
    return %arg1, %c0_i32, %arg0 : i32, i32, i32
  }
  func.func @transform_2(%arg0: i32, %arg1: i32) -> (i32, i32, i32) {
    %c0_i32 = arith.constant 0 : i32
    %c0_i32_0 = arith.constant 0 : i32
    return %arg1, %arg0, %c0_i32 : i32, i32, i32
  }
  func.func @transform_3(%arg0: i32, %arg1: i32) -> (i32, i32) {
    %c0_i32 = arith.constant 0 : i32
    %c0_i32_0 = arith.constant 0 : i32
    return %arg0, %c0_i32 : i32, i32
  }
}

</mosaic_0001>

<bundles_post_ra>
// kernel: tpu_custom_call.1
= control target key start
LH: loop header
LB: loop body
LE: loop exit
PB: predicated region body
PF: predicated region fallthrough
CT: control target
= control target key end

     0   :  { %8 = vsyncpa [#allocation4], 0  ;;  %s631_s12 = smov 0   ;;  %s633_s13 = smov 0   ;;  %s742_s0 = inlined_call_operand.vmem [shape: f32[6,1], index: 0, kind: input, shape index: {}]   ;;  %s743_s1 = inlined_call_operand.vmem [shape: f32[2,6,256], index: 1, kind: input, shape index: {}]   ;;  %s744_s2 = inlined_call_operand.vmem [shape: f32[2,256,6], index: 2, kind: input, shape index: {}]   ;;  %s745_s3 = inlined_call_operand.hbm [shape: f32[1,1], index: 3, kind: output, shape index: {}]  }
   0x1   :  { %s635_s14 = smov 0  }
   0x2 LB: > { %s493_s15 = sadd.s32 4294967295, %s606_s14   ;;  %s23_s16 = sadd.s32 1, %s602_s13  ;;  %s606_s14 = sphi %s635_s14, %s14_s14   ;;  %s602_s13 = sphi %s633_s13, %s748_s13   ;;  %s598_s12 = sphi %s631_s12, %s747_s12  }
   0x3   : > { %p24_p0 = scmp.ge.s32.totalorder %s23_s16, 2  ;;  %p496_p1 = scmp.ge.s32.totalorder %s606_s14, 1 }
   0x4   : > { %p174_p2 = scmp.lt.s32.totalorder %s606_s14, 3 }
   0x5   : > { %s750_s16 = smov (%p24_p0, %s23_s16), 0 }
   0x6   : > { %p175_p3 = pnand %p496_p1, %p174_p2 }
   0x7   : > { %p207_p4 = scmp.lt.s32.totalorder (!%p175_p3), %s598_s12, 1  ;;  %p501_p5 = scmp.ne.s32.totalorder (!%p175_p3), %s598_s12, 0 }
   0x8   : > { %178 = sbr.rel (%p175_p3) target bundleno = 449 (0x1c1), region = 32 }
   0xf   : > { %s208_s17 = scalar_select %p207_p4, %s598_s12, 1 }
  0x10   : > { %229 = sbr.rel (%p501_p5) target bundleno = 23 (0x17), region = 36  ;;  %v608_v0 = vmov (!%p501_p5), 0.0  }
  0x11   : > { %s507_s18 = sshll.u32 %s208_s17, 4  ;;  %s508_s19 = sshll.u32 %s208_s17, 8  ;;  %230 = vst [vmem:[#allocation2] sm:$0x3f] (!%p501_p5), %v608_v0  ;;  %231 = vst [vmem:[#allocation2 + $0x8] sm:$0x3f] (!%p501_p5), %v608_v0 }
  0x12   : > { %s657_s22 = scalar_lea.vmem %s743_s1, %s507_s18  ;;  %s662_s25 = scalar_lea.vmem %s744_s2, %s508_s19 }
  0x17 PF: > { %v234_v1 = vld [vmem:[%s662_s25] sm:$0xff]  ;;  %v609_v3 = vmov 0   ;;  %v235_v4 = vld [vmem:[%s662_s25 + $0x8] sm:$0xff]  ;;  %v236_v5 = vld [vmem:[%s662_s25 + $0x10] sm:$0xff]  ;;  %p502_p6 = scmp.ne.s32.totalorder %s598_s12, 1 }
  0x18   : > { %v332_v2 = vld [vmem:[%s742_s0] sm:$0x3f]  ;;  %544 = vset.pattern.permute.xlu1 %v609_v3  ;;  %266 = vxpose.xlu0.b32.start [1/16] (narrow) %v234_v1, 8  ;;  %v237_v6 = vld [vmem:[%s662_s25 + $0x18] sm:$0xff]  ;;  %v239_v8 = vld [vmem:[%s662_s25 + $0x28] sm:$0xff]  ;;  %vm394_vm2 = vcmask (!%p502_p6), 1045504  }
  0x19   : > { %371 = vperm.xlu1 %544, %v332_v2   ;;  %v238_v7 = vld [vmem:[%s662_s25 + $0x20] sm:$0xff]  ;;  %v240_v9 = vld [vmem:[%s662_s25 + $0x30] sm:$0xff]  ;;  %v241_v10 = vld [vmem:[%s662_s25 + $0x38] sm:$0xff]  ;;  %vm408_vm3 = vcmask (!%p502_p6), 0  }
  0x1a   : > { %v242_v11 = vld [vmem:[%s662_s25 + $0x40] sm:$0xff]  ;;  %v243_v12 = vld [vmem:[%s662_s25 + $0x48] sm:$0xff]  ;;  %v244_v13 = vld [vmem:[%s662_s25 + $0x50] sm:$0xff] }
  0x1b   : > { %v250_v14 = vld [vmem:[%s662_s25 + $0x80] sm:$0xff]  ;;  %v245_v15 = vld [vmem:[%s662_s25 + $0x58] sm:$0xff]  ;;  %v251_v16 = vld [vmem:[%s662_s25 + $0x88] sm:$0xff] }
  0x1c   : > { %267 = vxpose.xlu0.b32.cont [2/16] (narrow) %v235_v4, 8  ;;  %v246_v17 = vld [vmem:[%s662_s25 + $0x60] sm:$0xff]  ;;  %v252_v18 = vld [vmem:[%s662_s25 + $0x90] sm:$0xff]  ;;  %v247_v19 = vld [vmem:[%s662_s25 + $0x68] sm:$0xff] }
  0x1d   : > { %v253_v20 = vld [vmem:[%s662_s25 + $0x98] sm:$0xff]  ;;  %v248_v21 = vld [vmem:[%s662_s25 + $0x70] sm:$0xff]  ;;  %v254_v22 = vld [vmem:[%s662_s25 + $0xa0] sm:$0xff] }
  0x1e   : > { %v249_v23 = vld [vmem:[%s662_s25 + $0x78] sm:$0xff]  ;;  %v255_v24 = vld [vmem:[%s662_s25 + $0xa8] sm:$0xff]  ;;  %v256_v25 = vld [vmem:[%s662_s25 + $0xb0] sm:$0xff] }
  0x1f   : > { %v257_v26 = vld [vmem:[%s662_s25 + $0xb8] sm:$0xff]  ;;  %v258_v27 = vld [vmem:[%s662_s25 + $0xc0] sm:$0xff]  ;;  %v259_v28 = vld [vmem:[%s662_s25 + $0xc8] sm:$0xff] }
  0x20   : > { %268 = vxpose.xlu0.b32.cont [3/16] (narrow) %v236_v5, 8  ;;  %v260_v29 = vld [vmem:[%s662_s25 + $0xd0] sm:$0xff]  ;;  %v232_v30 = vld [vmem:[%s657_s22] sm:$0x3f]  ;;  %v261_v32 = vld [vmem:[%s662_s25 + $0xd8] sm:$0xff] }
  0x21   : > { %v333_v31 = vand.u32 2147483647, %v232_v30  ;;  %v262_v34 = vld [vmem:[%s662_s25 + $0xe0] sm:$0xff]  ;;  %v263_v36 = vld [vmem:[%s662_s25 + $0xe8] sm:$0xff]  ;;  %v264_v37 = vld [vmem:[%s662_s25 + $0xf0] sm:$0xff]  ;;  %v359_v46 = vsub.f32 0.0, %v232_v30 }
  0x22   : > { %v265_v38 = vld [vmem:[%s662_s25 + $0xf8] sm:$0xff]  ;;  %v233_v45 = vld [vmem:[%s657_s22 + $0x8] sm:$0x3f]  ;;  %v382_v63 = vld [vmem:[#allocation2] sm:$0x3f] }
  0x23   : > { %v335_v33 = vsub.f32 0.0, %v333_v31  ;;  %v334_v49 = vand.u32 2147483647, %v233_v45  ;;  %v361_v50 = vmax.f32 %v359_v46, 0.0 }
  0x24   : > { %269 = vxpose.xlu0.b32.cont [4/16] (narrow) %v237_v6, 8 }
  0x25   : > { %v337_v35 = vmul.f32 1.442695, %v335_v33  ;;  %v336_v53 = vsub.f32 0.0, %v334_v49 }
  0x27   : > { %546 = vpow2.f32 %v337_v35  ;;  %v339_v59 = vmul.f32 1.442695, %v336_v53 }
  0x28   : > { %270 = vxpose.xlu0.b32.cont [5/16] (narrow) %v238_v7, 8 }
  0x2c   : > { %271 = vxpose.xlu0.b32.cont [6/16] (narrow) %v239_v8, 8  ;;  %v360_v8 = vsub.f32 0.0, %v233_v45 }
  0x30   : > { %272 = vxpose.xlu0.b32.cont [7/16] (narrow) %v240_v9, 8 }
  0x31   : > { %v547_v39 = vpop.eup %546 }
  0x32   : > { %v341_v40 = vadd.f32 1.0, %v547_v39  ;;  %v344_v41 = vmul.f32 -0.5, %v547_v39  ;;  %v347_v44 = vand.u32 2147483647, %v547_v39 }
  0x34   : > { %273 = vxpose.xlu0.b32.cont [8/16] (narrow) %v241_v10, 8  ;;  %548 = vlog2.f32 %v341_v40  ;;  %v345_v42 = vadd.f32 1.0, %v344_v41  ;;  %vm348_vm0 = vcmp.lt.f32.partialorder %v347_v44, 0.0004427343 }
  0x35   : > { %550 = vpow2.f32 %v339_v59 }
  0x36   : > { %v346_v48 = vmul.f32 %v547_v39, %v345_v42 }
  0x38   : > { %274 = vxpose.xlu0.b32.cont [9/16] (narrow) %v242_v11, 8  ;;  %v362_v11 = vmax.f32 %v360_v8, 0.0 }
  0x3c   : > { %275 = vxpose.xlu0.b32.cont [10/16] (narrow) %v243_v12, 8 }
  0x3e   : > { %v549_v43 = vpop.eup %548 }
  0x3f   : > { %v343_v47 = vmul.f32 0.6931472, %v549_v43  ;;  %v551_v2 = vpop.eup %550 }
  0x40   : > { %276 = vxpose.xlu0.b32.cont [11/16] (narrow) %v244_v13, 8  ;;  %v353_v4 = vmul.f32 -0.5, %v551_v2  ;;  %v356_v7 = vand.u32 2147483647, %v551_v2 }
  0x41   : > { %v349_v52 = vsel %vm348_vm0, %v346_v48, %v343_v47 }
  0x42   : > { %298 = vxpose.xlu1.b32.start [1/16] (narrow) %v250_v14, 8  ;;  %v363_v56 = vadd.f32 %v361_v50, %v349_v52  ;;  %v354_v5 = vadd.f32 1.0, %v353_v4  ;;  %vm357_vm1 = vcmp.lt.f32.partialorder %v356_v7, 0.0004427343 }
  0x44   : > { %277 = vxpose.xlu0.b32.cont [12/16] (narrow) %v245_v15, 8  ;;  %v355_v10 = vmul.f32 %v551_v2, %v354_v5 }
  0x46   : > { %299 = vxpose.xlu1.b32.cont [2/16] (narrow) %v251_v16, 8 }
  0x48   : > { %278 = vxpose.xlu0.b32.cont [13/16] (narrow) %v246_v17, 8 }
  0x4a   : > { %300 = vxpose.xlu1.b32.cont [3/16] (narrow) %v252_v18, 8 }
  0x4c   : > { %279 = vxpose.xlu0.b32.cont [14/16] (narrow) %v247_v19, 8 }
  0x4e   : > { %301 = vxpose.xlu1.b32.cont [4/16] (narrow) %v253_v20, 8 }
  0x50   : > { %280 = vxpose.xlu0.b32.cont [15/16] (narrow) %v248_v21, 8  ;;  %v383_v21 = vld [vmem:[#allocation2 + $0x8] sm:$0x3f] }
  0x52   : > { %302 = vxpose.xlu1.b32.cont [5/16] (narrow) %v254_v22, 8 }
  0x54   : > { %281 = vxpose.xlu0.b32.end [16/16] (narrow) %v249_v23, 8 }
  0x56   : > { %303 = vxpose.xlu1.b32.cont [6/16] (narrow) %v255_v24, 8 }
  0x5a   : > { %304 = vxpose.xlu1.b32.cont [7/16] (narrow) %v256_v25, 8 }
  0x5e   : > { %305 = vxpose.xlu1.b32.cont [8/16] (narrow) %v257_v26, 8 }
  0x62   : > { %306 = vxpose.xlu1.b32.cont [9/16] (narrow) %v258_v27, 8 }
  0x66   : > { %307 = vxpose.xlu1.b32.cont [10/16] (narrow) %v259_v28, 8 }
  0x6a   : > { %308 = vxpose.xlu1.b32.cont [11/16] (narrow) %v260_v29, 8 }
  0x6e   : > { %309 = vxpose.xlu1.b32.cont [12/16] (narrow) %v261_v32, 8 }
  0x72   : > { %310 = vxpose.xlu1.b32.cont [13/16] (narrow) %v262_v34, 8 }
  0x76   : > { %311 = vxpose.xlu1.b32.cont [14/16] (narrow) %v263_v36, 8 }
  0x7a   : > { %312 = vxpose.xlu1.b32.cont [15/16] (narrow) %v264_v37, 8 }
  0x7d   : > { %545 = vset.pattern.permute.xlu0 %v609_v3  ;;  %v350_v3 = vadd.f32 1.0, %v551_v2 }
  0x7e   : > { %313 = vxpose.xlu1.b32.end [16/16] (narrow) %v265_v38, 8 }
  0x7f   : > { %552 = vlog2.f32 %v350_v3 }
  0x89   : > { %v553_v6 = vpop.eup %552 }
  0x8a   : > { %v352_v9 = vmul.f32 0.6931472, %v553_v6 }
  0x8c   : > { %v358_v13 = vsel %vm357_vm1, %v355_v10, %v352_v9 }
  0x8d   : > { %v364_v15 = vadd.f32 %v362_v11, %v358_v13 }
  0x98   : > { %v282_v51 = vpop.trf.xlu0  ;;  %v372_v55 = vpop.permute.xlu1 %371 }
  0x99   : > { %v330_v54 = vmul.f32 0.003921569, %v282_v51 }
  0x9b   : > { %v365_v57 = vsub.f32 1.0, %v330_v54  ;;  %v374_v58 = vmul.f32 %v372_v55, %v330_v54 }
  0x9d   : > { %v367_v60 = vmul.f32 %v365_v57, %v232_v30  ;;  %v376_v61 = vadd.f32 1.0, %v374_v58 }
  0x9f   : > { %v378_v62 = vmul.f32 %v376_v61, %v363_v56 }
  0xa1   : > { %v380_v0 = vadd.f32 %v378_v62, %v367_v60 }
  0xa3   : > { %v384_v1 = vadd.f32 %v382_v63, %v380_v0 }
  0xa5   : > { %386 = vst [vmem:[#allocation2] sm:$0x3f] %v384_v1 }
  0xac   : > { %v392_v24 = vld [vmem:[#allocation2] sm:$0x3f] (!%p502_p6) }
  0xad   : > { %v395_v26 = vsel (!%p502_p6), %vm394_vm2, %v392_v24, 0.0 }
  0xc2   : > { %v314_v12 = vpop.trf.xlu1 }
  0xc3   : > { %v331_v14 = vmul.f32 0.003921569, %v314_v12 }
  0xc5   : > { %v366_v16 = vsub.f32 1.0, %v331_v14  ;;  %v375_v17 = vmul.f32 %v372_v55, %v331_v14 }
  0xc7   : > { %v377_v18 = vadd.f32 1.0, %v375_v17  ;;  %v368_v19 = vmul.f32 %v366_v16, %v233_v45 }
  0xc9   : > { %v379_v20 = vmul.f32 %v377_v18, %v364_v15  ;;  %391 = sbr.rel (%p502_p6) target bundleno = 424 (0x1a8), region = 40 }
  0xcb   : > { %v381_v22 = vadd.f32 %v379_v20, %v368_v19 }
  0xcd   : > { %v385_v23 = vadd.f32 %v383_v21, %v381_v22 }
  0xcf   : > { %387 = vst [vmem:[#allocation2 + $0x8] sm:$0x3f] %v385_v23 }
  0xd6   : > { %v393_v25 = vld [vmem:[#allocation2 + $0x8] sm:$0x3f] }
  0xd7   : > { %v396_v27 = vsel %vm394_vm2, %v393_v25, 0.0 }
  0xd8   : > { %v397_v28 = vadd.f32 %v396_v27, %v395_v26 }
  0xda   : > { %398 = vadd.xlane.f32.xlu0 %v397_v28 }
 0x167   : > { %v399_v29 = vpop.xlane.xlu0 %398 }
 0x168   : > { %v400_v30 = vrot.slane %v399_v29, 4 }
 0x16a   : > { %v401_v31 = vadd.f32 %v400_v30, %v399_v29 }
 0x16c   : > { %v402_v32 = vrot.slane %v401_v31, 2 }
 0x16e   : > { %v403_v33 = vadd.f32 %v402_v32, %v401_v31 }
 0x170   : > { %v404_v34 = vrot.slane %v403_v33, 1 }
 0x172   : > { %v405_v35 = vadd.f32 %v404_v34, %v403_v33 }
 0x174   : > { %509 = vpush %v405_v35 }
 0x1a5   : > { %s510_s28 = spop %509 }
 0x1a6   : > { %v407_v36 = vstv %s510_s28 }
 0x1a7   : > { %409 = vst.msk [vmem:[#allocation3] sm:$0x1] %vm408_vm3, %v407_v36 }
 0x1a8 PF: > { %p707_p7 = scmp.eq.s32.totalorder %s493_s15, 1  ;;  %s610_s30 = smov [#allocation3]  }
 0x1a9   : > { %s419_s4 = sshll.u32 %s610_s30, 4  ;;  %s420_s4 = int_to_ptr.vmem [resolvable:$true] %s419_s4 }
 0x1aa   : > { %s554_s5 = scalar_lea.vmem %s420_s4, 16  ;;  %s560_s6 = scalar_lea.vmem %s420_s4, 32 }
 0x1ab   : > { %p555_p8 = scmp.ne.s32.totalorder %s420_s4, %s554_s5  ;;  %p561_p11 = scmp.lt.s32.totalorder %s420_s4, %s420_s4 }
 0x1ac   : > { %p562_p12 = scmp.lt.s32.totalorder %s560_s6, %s554_s5 }
 0x1ad   : > { %p556_p9 = pnand %p555_p8, %p707_p7 }
 0x1ae   : > { %p563_p13 = por %p562_p12, %p561_p11 }
 0x1af   : > { %p557_p10 = pneg %p556_p9 }
 0x1b1   : > { %p564_p0 = pnand %p563_p13, %p557_p10 }
 0x1b3   : > { %567 = shalt.err (!%p564_p0)
}
 0x1b4   : > { %s568_s9 = scalar_lea.hbm %s745_s3, 16 }
 0x1b5   : > { %p569_p1 = scmp.ne.s32.totalorder %s745_s3, %s568_s9  ;;  %p574_p4 = scmp.lt.u32.totalorder %s568_s9, %s745_s3 }
 0x1b7   : > { %p570_p2 = pnand %p569_p1, %p707_p7 }
 0x1b9   : > { %p571_p3 = pneg %p570_p2 }
 0x1bb   : > { %p576_p5 = pnand %p574_p4, %p571_p3 }
 0x1bd   : > { %579 = shalt.err (!%p576_p5)
}
 0x1be   : > { %512 = dma.vmem_to_hbm [thread:$0]  (%p707_p7), %s420_s4, 16, %s745_s3, [#allocation4]  }
 0x1bf   : > { %593 = dma.done.wait (%p707_p7), [#allocation4], 16  }
 0x1c0   : > { %595 = vsyncadd (%p707_p7), [#allocation4], 4294967280 }
 0x1c1 PF: > { %s14_s14 = sadd.s32 1, %s606_s14   ;;  %s747_s12 = smov %s602_s13 }
 0x1c2   : > { %p11_p6 = scmp.ge.s32.totalorder %s14_s14, 4   ;;  %s748_s13 = smov %s750_s16 }
 0x1c4   :  { %13 = sbr.rel (!%p11_p6) target bundleno = 2 (0x2), region = 71 }
 0x1cb   :  { %432 = vsyncpa [#allocation4], 1 }
 0x1cc   :  { %434 = vsyncpa [#allocation4 + $0x1], 1 }

</bundles_post_ra>
